<compile_context>
chip_gen: v7x
topology: tpu7x:2x2x1
jax: 0.10.0
libtpu: 0.0.40
codegen_flags: <defaults>
</compile_context>

<pallas_src>
import functools

import jax
import jax.numpy as jnp
from jax.experimental import pallas as pl
from jax.experimental.pallas import tpu as pltpu

LANE = 128  # TPU vreg lane width


def _round_up(x, m):
    return ((x + m - 1) // m) * m


def mlp_logsoftmax_kernel(x_ref, w1_ref, b1_ref, w2_ref, b2_ref, w3d_ref, b3d_ref, o_ref):
    """One batch block of the full forward pass.

    x_ref:  (bB, 2)        input block
    w1_ref: (2, Hp)        fc1 weight (zero-padded to Hp lanes), f32
    b1_ref: (1, Hp)        f32
    w2_ref: (Hp, Hp)       fc2 weight, f32 or bf16 (optional fast path)
    b2_ref: (1, Hp)        f32
    w3d_ref:(1, Hp)        w3[:,1] - w3[:,0] (zero-padded), f32
    b3d_ref:(1,)  SMEM     b3[1] - b3[0]
    o_ref:  (bB, 2)        compact log-softmax output block
    """
    x = x_ref[...].astype(jnp.float32)
    x0 = x[:, 0:1]  # (bB, 1)
    x1 = x[:, 1:2]

    # fc1 + ReLU: K=2 contraction done as broadcast multiply-adds (VPU only).
    h1 = x0 * w1_ref[0:1, :] + x1 * w1_ref[1:2, :] + b1_ref[...]
    h1 = jnp.maximum(h1, 0.0)

    # fc2 + ReLU: the only MXU matmul, lane-dense (Hp x Hp), f32 accumulate.
    # Cast LHS to the weight dtype so the optional bf16 fast path feeds the MXU
    # with bf16 operands (no-op cast when the weight is f32).
    h2 = jnp.dot(h1.astype(w2_ref.dtype), w2_ref[...], preferred_element_type=jnp.float32)
    h2 = jnp.maximum(h2 + b2_ref[...], 0.0)

    # fc3 + 2-class log-softmax collapsed into the logit difference d.
    # Cross-lane reduction rides the XLU slot (slack vs the MXU-bound matmul).
    d = jnp.sum(h2 * w3d_ref[...], axis=-1, keepdims=True) + b3d_ref[0]  # (bB, 1)

    # Numerically stable softplus built from ops guaranteed to lower on Mosaic.
    def softplus(t):
        return jnp.maximum(t, 0.0) + jnp.log(1.0 + jnp.exp(-jnp.abs(t)))

    # Compact store: only the two real columns exist in the output block.
    o_ref[:, 0:1] = -softplus(d)     # log_softmax[..., 0]
    o_ref[:, 1:2] = -softplus(-d)    # log_softmax[..., 1]


@functools.partial(jax.jit, static_argnames=("block_b", "fc2_bf16"))
def example_model_forward(x, params, *, block_b=4096, fc2_bf16=False):
    """x: (B, 2) float32; params: (w1,b1,w2,b2,w3,b3) with weights stored (in, out).

    fc2_bf16=True feeds the fc2 MXU matmul with bf16 operands (f32 accumulate):
    ~3x fewer MXU pushes on v6e/v7x, at the cost of ~1e-2-level numerical drift.
    """
    w1, b1, w2, b2, w3, b3 = params
    H = w1.shape[1]
    Hp = _round_up(max(H, LANE), LANE)  # pad hidden dim to lane width (128)
    B = x.shape[0]

    # Zero-pad weights to lane-dense layouts. Exact: padded hidden units get
    # bias 0 -> ReLU(0) = 0, and padded w3-diff lanes are 0, so results match.
    w1p = jnp.zeros((2, Hp), jnp.float32).at[:, :H].set(w1)
    b1p = jnp.zeros((1, Hp), jnp.float32).at[:, :H].set(b1)
    w2p = jnp.zeros((Hp, Hp), jnp.float32).at[:H, :H].set(w2)
    if fc2_bf16:
        w2p = w2p.astype(jnp.bfloat16)  # cast once here, not per block
    b2p = jnp.zeros((1, Hp), jnp.float32).at[:, :H].set(b2)
    w3d = jnp.zeros((1, Hp), jnp.float32).at[0, :H].set(w3[:, 1] - w3[:, 0])
    b3d = (b3[0, 1] - b3[0, 0]).reshape((1,)).astype(jnp.float32)

    # Batch tiling: large blocks amortize the ~0.35 us per-grid-step overhead;
    # for large batches keep >= 2 grid steps so the "parallel" axis can shard
    # across both v7x TensorCores (one core would otherwise idle).
    bB = min(block_b, _round_up(B, 8))
    if B >= 1024 and _round_up(B, bB) // bB < 2:
        bB = _round_up((B + 1) // 2, 8)
    Bp = _round_up(B, bB)

    xp = x.astype(jnp.float32)
    if Bp != B:
        xp = jnp.zeros((Bp, 2), jnp.float32).at[:B].set(xp)
    grid = (Bp // bB,)

    cost = pl.CostEstimate(
        flops=2 * Bp * Hp * Hp + 8 * Bp * Hp,     # fc2 matmul + elementwise/fc1/fc3
        transcendentals=3 * Bp,                   # exp/log per row
        bytes_accessed=(Bp * 2 + (Hp + 5) * Hp + Bp * 2) * 4,
    )

    out = pl.pallas_call(
        mlp_logsoftmax_kernel,
        out_shape=jax.ShapeDtypeStruct((Bp, 2), jnp.float32),
        grid=grid,
        in_specs=[
            pl.BlockSpec((bB, 2), lambda i: (i, 0)),        # x: tiled over batch
            pl.BlockSpec((2, Hp), lambda i: (0, 0)),        # weights stay VMEM-resident
            pl.BlockSpec((1, Hp), lambda i: (0, 0)),
            pl.BlockSpec((Hp, Hp), lambda i: (0, 0)),
            pl.BlockSpec((1, Hp), lambda i: (0, 0)),
            pl.BlockSpec((1, Hp), lambda i: (0, 0)),
            pl.BlockSpec(memory_space=pltpu.MemorySpace.SMEM),  # scalar bias diff
        ],
        out_specs=pl.BlockSpec((bB, 2), lambda i: (i, 0)),  # compact lane-2 output block
        compiler_params=pltpu.CompilerParams(
            dimension_semantics=("parallel",),
        ),
        cost_estimate=cost,
    )(xp, w1p, b1p, w2p, b2p, w3d, b3d)

    return out[:B] if Bp != B else out


def init_params(key, model_size):
    """Deterministic init mirroring nn.Linear default: U(-1/sqrt(fan_in), 1/sqrt(fan_in)).
    Weights stored as (in, out). Biases stored as (1, out)."""
    def linear(key, fan_in, fan_out):
        kw, kb = jax.random.split(key)
        bound = 1.0 / jnp.sqrt(jnp.float32(fan_in))
        w = jax.random.uniform(kw, (fan_in, fan_out), jnp.float32, -bound, bound)
        b = jax.random.uniform(kb, (1, fan_out), jnp.float32, -bound, bound)
        return w, b

    k1, k2, k3 = jax.random.split(key, 3)
    w1, b1 = linear(k1, 2, model_size)
    w2, b2 = linear(k2, model_size, model_size)
    w3, b3 = linear(k3, model_size, 2)
    return (w1, b1, w2, b2, w3, b3)


def reference_forward(x, params):
    """Pure-JAX reference for correctness checking."""
    w1, b1, w2, b2, w3, b3 = params
    h1 = jnp.maximum(x @ w1 + b1, 0.0)
    h2 = jnp.maximum(h1 @ w2 + b2, 0.0)
    logits = h2 @ w3 + b3
    return jax.nn.log_softmax(logits, axis=1)


if __name__ == "__main__":
    model_size = 32

    key = jax.random.PRNGKey(0)
    k_params, k_x1, k_x2, k_x3 = jax.random.split(key, 4)
    params = init_params(k_params, model_size)

    # Primary check: batch = 8 (f32 everywhere, strict tolerance)
    x = jax.random.normal(k_x1, (8, 2), jnp.float32)
    out = jax.block_until_ready(example_model_forward(x, params))
    ref = reference_forward(x, params)
    assert out.shape == (8, 2), out.shape
    assert jnp.allclose(out, ref, atol=1e-5, rtol=1e-5), "mismatch vs reference (B=8)"

    # Batch not a multiple of 8 (exercises batch-padding path)
    x2 = jax.random.normal(k_x2, (5, 2), jnp.float32)
    out2 = jax.block_until_ready(example_model_forward(x2, params))
    ref2 = reference_forward(x2, params)
    assert out2.shape == (5, 2), out2.shape
    assert jnp.allclose(out2, ref2, atol=1e-5, rtol=1e-5), "mismatch vs reference (B=5)"

    # Large batch (exercises multi-block grid + >=2-step megacore split)
    x3 = jax.random.normal(k_x3, (2048, 2), jnp.float32)
    out3 = jax.block_until_ready(example_model_forward(x3, params))
    ref3 = reference_forward(x3, params)
    assert out3.shape == (2048, 2), out3.shape
    assert jnp.allclose(out3, ref3, atol=1e-5, rtol=1e-5), "mismatch vs reference (B=2048)"

    # Optional bf16 MXU fast path (v6e/v7x): f32 accumulate, loosened tolerance.
    out4 = jax.block_until_ready(example_model_forward(x, params, fc2_bf16=True))
    assert jnp.allclose(out4, ref, atol=1e-1, rtol=1e-1), "mismatch vs reference (bf16 fc2)"

    print("KERNEL_OK")
</pallas_src>

<mosaic_0001>
module attributes {stable_mosaic.version = 11 : i64} {
  func.func @mlp_logsoftmax_kernel(%arg0: i32, %arg1: memref<8x2xf32, #tpu.memory_space<vmem>>, %arg2: memref<2x128xf32, #tpu.memory_space<vmem>>, %arg3: memref<1x128xf32, #tpu.memory_space<vmem>>, %arg4: memref<128x128xf32, #tpu.memory_space<vmem>>, %arg5: memref<1x128xf32, #tpu.memory_space<vmem>>, %arg6: memref<1x128xf32, #tpu.memory_space<vmem>>, %arg7: memref<1xf32, #tpu.memory_space<smem>>, %arg8: memref<8x2xf32, #tpu.memory_space<vmem>>) attributes {dimension_semantics = [#tpu.dimension_semantics<parallel>], iteration_bounds = array<i64: 1>, scalar_prefetch = 0 : i64, scratch_operands = 0 : i64, tpu.core_type = #tpu.core_type<tc>, window_params = [{transform_indices = @transform_0, window_bounds = array<i64: 8, 2>}, {pipeline_mode = #tpu.pipeline_mode<synchronous>, transform_indices = @transform_1, window_bounds = array<i64: 2, 128>}, {pipeline_mode = #tpu.pipeline_mode<synchronous>, transform_indices = @transform_2, window_bounds = array<i64: 1, 128>}, {pipeline_mode = #tpu.pipeline_mode<synchronous>, transform_indices = @transform_3, window_bounds = array<i64: 128, 128>}, {pipeline_mode = #tpu.pipeline_mode<synchronous>, transform_indices = @transform_4, window_bounds = array<i64: 1, 128>}, {pipeline_mode = #tpu.pipeline_mode<synchronous>, transform_indices = @transform_5, window_bounds = array<i64: 1, 128>}, {transform_indices = @transform_6, window_bounds = array<i64: 1>}, {transform_indices = @transform_7, window_bounds = array<i64: 8, 2>}]} {
    %c0 = arith.constant 0 : index
    %c0_0 = arith.constant 0 : index
    %0 = vector.load %arg1[%c0, %c0_0] : memref<8x2xf32, #tpu.memory_space<vmem>>, vector<8x2xf32>
    %1 = vector.extract_strided_slice %0 {offsets = [0, 0], sizes = [8, 1], strides = [1, 1]} : vector<8x2xf32> to vector<8x1xf32>
    %2 = vector.extract_strided_slice %0 {offsets = [0, 1], sizes = [8, 1], strides = [1, 1]} : vector<8x2xf32> to vector<8x1xf32>
    %c0_1 = arith.constant 0 : index
    %c0_2 = arith.constant 0 : index
    %3 = vector.load %arg2[%c0_1, %c0_2] : memref<2x128xf32, #tpu.memory_space<vmem>>, vector<1x128xf32>
    %4 = vector.broadcast %1 : vector<8x1xf32> to vector<8x128xf32>
    %5 = vector.broadcast %3 : vector<1x128xf32> to vector<8x128xf32>
    %6 = arith.mulf %4, %5 : vector<8x128xf32>
    %c1 = arith.constant 1 : index
    %c0_3 = arith.constant 0 : index
    %7 = vector.load %arg2[%c1, %c0_3] : memref<2x128xf32, #tpu.memory_space<vmem>>, vector<1x128xf32>
    %8 = vector.broadcast %2 : vector<8x1xf32> to vector<8x128xf32>
    %9 = vector.broadcast %7 : vector<1x128xf32> to vector<8x128xf32>
    %10 = arith.mulf %8, %9 : vector<8x128xf32>
    %11 = arith.addf %6, %10 : vector<8x128xf32>
    %c0_4 = arith.constant 0 : index
    %c0_5 = arith.constant 0 : index
    %12 = vector.load %arg3[%c0_4, %c0_5] : memref<1x128xf32, #tpu.memory_space<vmem>>, vector<1x128xf32>
    %13 = vector.broadcast %12 : vector<1x128xf32> to vector<8x128xf32>
    %14 = arith.addf %11, %13 : vector<8x128xf32>
    %cst = arith.constant 0.000000e+00 : f32
    %15 = vector.broadcast %cst : f32 to vector<8x128xf32>
    %16 = arith.maximumf %14, %15 : vector<8x128xf32>
    %c0_6 = arith.constant 0 : index
    %c0_7 = arith.constant 0 : index
    %17 = vector.load %arg4[%c0_6, %c0_7] : memref<128x128xf32, #tpu.memory_space<vmem>>, vector<128x128xf32>
    %cst_8 = arith.constant dense<0.000000e+00> : vector<8x128xf32>
    %18 = tpu.matmul %16, %17, %cst_8 {dimension_numbers = #tpu.dot_dimension_numbers<[1], [0], [0], [1], [0, 0, 1, 1], [], []>} : vector<8x128xf32>, vector<128x128xf32>, vector<8x128xf32> -> vector<8x128xf32>
    %c0_9 = arith.constant 0 : index
    %c0_10 = arith.constant 0 : index
    %19 = vector.load %arg5[%c0_9, %c0_10] : memref<1x128xf32, #tpu.memory_space<vmem>>, vector<1x128xf32>
    %20 = vector.broadcast %19 : vector<1x128xf32> to vector<8x128xf32>
    %21 = arith.addf %18, %20 : vector<8x128xf32>
    %cst_11 = arith.constant 0.000000e+00 : f32
    %22 = vector.broadcast %cst_11 : f32 to vector<8x128xf32>
    %23 = arith.maximumf %21, %22 : vector<8x128xf32>
    %c0_12 = arith.constant 0 : index
    %c0_13 = arith.constant 0 : index
    %24 = vector.load %arg6[%c0_12, %c0_13] : memref<1x128xf32, #tpu.memory_space<vmem>>, vector<1x128xf32>
    %25 = vector.broadcast %24 : vector<1x128xf32> to vector<8x128xf32>
    %26 = arith.mulf %23, %25 : vector<8x128xf32>
    %cst_14 = arith.constant dense<0.000000e+00> : vector<8xf32>
    %27 = vector.multi_reduction <add>, %26, %cst_14 [1] : vector<8x128xf32> to vector<8xf32>
    %28 = vector.shape_cast %27 : vector<8xf32> to vector<8x1xf32>
    %c0_15 = arith.constant 0 : index
    %29 = memref.load %arg7[%c0_15] : memref<1xf32, #tpu.memory_space<smem>>
    %30 = vector.broadcast %29 : f32 to vector<8x1xf32>
    %31 = arith.addf %28, %30 : vector<8x1xf32>
    %cst_16 = arith.constant 0.000000e+00 : f32
    %32 = vector.broadcast %cst_16 : f32 to vector<8x1xf32>
    %33 = arith.maximumf %31, %32 : vector<8x1xf32>
    %34 = math.absf %31 : vector<8x1xf32>
    %cst_17 = arith.constant 0.000000e+00 : f32
    %35 = vector.broadcast %cst_17 : f32 to vector<8x1xf32>
    %36 = arith.subf %35, %34 : vector<8x1xf32>
    %37 = math.exp %36 : vector<8x1xf32>
    %cst_18 = arith.constant 1.000000e+00 : f32
    %38 = vector.broadcast %cst_18 : f32 to vector<8x1xf32>
    %39 = arith.addf %38, %37 : vector<8x1xf32>
    %40 = math.log %39 : vector<8x1xf32>
    %41 = arith.addf %33, %40 : vector<8x1xf32>
    %cst_19 = arith.constant 0.000000e+00 : f32
    %42 = vector.broadcast %cst_19 : f32 to vector<8x1xf32>
    %43 = arith.subf %42, %41 : vector<8x1xf32>
    %c0_20 = arith.constant 0 : index
    %c0_21 = arith.constant 0 : index
    %44 = vector.load %arg8[%c0_20, %c0_21] : memref<8x2xf32, #tpu.memory_space<vmem>>, vector<8x1xf32>
    tpu.vector_store %arg8[%c0_20, %c0_21], %43 {strides = array<i32>} : memref<8x2xf32, #tpu.memory_space<vmem>>, vector<8x1xf32>,
    %cst_22 = arith.constant 0.000000e+00 : f32
    %45 = vector.broadcast %cst_22 : f32 to vector<8x1xf32>
    %46 = arith.subf %45, %31 : vector<8x1xf32>
    %cst_23 = arith.constant 0.000000e+00 : f32
    %47 = vector.broadcast %cst_23 : f32 to vector<8x1xf32>
    %48 = arith.maximumf %46, %47 : vector<8x1xf32>
    %49 = math.absf %46 : vector<8x1xf32>
    %cst_24 = arith.constant 0.000000e+00 : f32
    %50 = vector.broadcast %cst_24 : f32 to vector<8x1xf32>
    %51 = arith.subf %50, %49 : vector<8x1xf32>
    %52 = math.exp %51 : vector<8x1xf32>
    %cst_25 = arith.constant 1.000000e+00 : f32
    %53 = vector.broadcast %cst_25 : f32 to vector<8x1xf32>
    %54 = arith.addf %53, %52 : vector<8x1xf32>
    %55 = math.log %54 : vector<8x1xf32>
    %56 = arith.addf %48, %55 : vector<8x1xf32>
    %cst_26 = arith.constant 0.000000e+00 : f32
    %57 = vector.broadcast %cst_26 : f32 to vector<8x1xf32>
    %58 = arith.subf %57, %56 : vector<8x1xf32>
    %c0_27 = arith.constant 0 : index
    %c1_28 = arith.constant 1 : index
    %59 = vector.load %arg8[%c0_27, %c1_28] : memref<8x2xf32, #tpu.memory_space<vmem>>, vector<8x1xf32>
    tpu.vector_store %arg8[%c0_27, %c1_28], %58 {strides = array<i32>} : memref<8x2xf32, #tpu.memory_space<vmem>>, vector<8x1xf32>,
    return
  }
  func.func @transform_0(%arg0: i32) -> (i32, i32) {
    %c0_i32 = arith.constant 0 : i32
    %c0_i32_0 = arith.constant 0 : i32
    return %arg0, %c0_i32 : i32, i32
  }
  func.func @transform_1(%arg0: i32) -> (i32, i32) {
    %c0_i32 = arith.constant 0 : i32
    %c0_i32_0 = arith.constant 0 : i32
    %c0_i32_1 = arith.constant 0 : i32
    return %c0_i32, %c0_i32_0 : i32, i32
  }
  func.func @transform_2(%arg0: i32) -> (i32, i32) {
    %c0_i32 = arith.constant 0 : i32
    %c0_i32_0 = arith.constant 0 : i32
    %c0_i32_1 = arith.constant 0 : i32
    return %c0_i32, %c0_i32_0 : i32, i32
  }
  func.func @transform_3(%arg0: i32) -> (i32, i32) {
    %c0_i32 = arith.constant 0 : i32
    %c0_i32_0 = arith.constant 0 : i32
    %c0_i32_1 = arith.constant 0 : i32
    return %c0_i32, %c0_i32_0 : i32, i32
  }
  func.func @transform_4(%arg0: i32) -> (i32, i32) {
    %c0_i32 = arith.constant 0 : i32
    %c0_i32_0 = arith.constant 0 : i32
    %c0_i32_1 = arith.constant 0 : i32
    return %c0_i32, %c0_i32_0 : i32, i32
  }
  func.func @transform_5(%arg0: i32) -> (i32, i32) {
    %c0_i32 = arith.constant 0 : i32
    %c0_i32_0 = arith.constant 0 : i32
    %c0_i32_1 = arith.constant 0 : i32
    return %c0_i32, %c0_i32_0 : i32, i32
  }
  func.func @transform_6(%arg0: i32) -> i32 {
    %c0_i32 = arith.constant 0 : i32
    %c0_i32_0 = arith.constant 0 : i32
    return %c0_i32 : i32
  }
  func.func @transform_7(%arg0: i32) -> (i32, i32) {
    %c0_i32 = arith.constant 0 : i32
    %c0_i32_0 = arith.constant 0 : i32
    return %arg0, %c0_i32 : i32, i32
  }
}

</mosaic_0001>

<bundles_post_ra>
// kernel: example_model_forward.1
= control target key start
LH: loop header
LB: loop body
LE: loop exit
PB: predicated region body
PF: predicated region fallthrough
CT: control target
= control target key end

     0   :  { %v291_v0 = vmov 0   ;;  %v292_v2 = vmov 0.0|0.0   ;;  %v293_v11 = vmov 1   ;;  %vm294_vm0 = vmmov 0   ;;  %s411_s0 = inlined_call_operand.vmem [shape: f32[8,2], index: 0, kind: input, shape index: {}]   ;;  %s412_s3 = inlined_call_operand.vmem [shape: f32[128,128], index: 3, kind: input, shape index: {}]   ;;  %s413_s1 = inlined_call_operand.vmem [shape: f32[2,128], index: 1, kind: input, shape index: {}]   ;;  %s414_s2 = inlined_call_operand.vmem [shape: f32[1,128], index: 2, kind: input, shape index: {}]   ;;  %s415_s4 = inlined_call_operand.vmem [shape: f32[1,128], index: 4, kind: input, shape index: {}]   ;;  %s416_s5 = inlined_call_operand.vmem [shape: f32[1,128], index: 5, kind: input, shape index: {}]   ;;  %s417_s6 = inlined_call_operand.<no memory space> [shape: f32[1], index: 6, kind: input, shape index: {}]   ;;  %s418_s7 = inlined_call_operand.vmem [shape: f32[8,2], index: 7, kind: output, shape index: {}]  }
   0x1   :  { %281 = vset.pattern.permute.xlu0 %v291_v0  ;;  %v27_v1 = vld [vmem:[%s411_s0] sm:$0xff]  ;;  %252 = vmatprep.subr.bf16.mxu0 %v292_v2  ;;  %v60_v4 = vld [vmem:[%s412_s3 + $0x8] sm:$0xff]  ;;  %v61_v6 = vld [vmem:[%s412_s3 + $0x10] sm:$0xff]  ;;  %v295_v15 = vmov 0.0   ;;  %v164_v46 = vstv %s417_s6  ;;  %vm176_vm1 = vcmask 7168   ;;  %vm189_vm2 = vcmask 15368  }
   0x2   :  { %v59_v3 = vld [vmem:[%s412_s3] sm:$0xff]  ;;  %31 = vperm.xlu0 %281, %v27_v1   ;;  %v62_v7 = vld [vmem:[%s412_s3 + $0x18] sm:$0xff]  ;;  %v64_v10 = vld [vmem:[%s412_s3 + $0x28] sm:$0xff]  ;;  %249 = vmatprep.mubr.msk.f32.mxu0 %vm294_vm0, %v295_v15 }
   0x3   :  { %v253_v5 = vpack.c.bf16 %v60_v4, %v59_v3  ;;  %v256_v8 = vpack.c.bf16 %v62_v7, %v61_v6  ;;  %v63_v9 = vld [vmem:[%s412_s3 + $0x20] sm:$0xff]  ;;  %v65_v13 = vld [vmem:[%s412_s3 + $0x30] sm:$0xff]  ;;  %v66_v14 = vld [vmem:[%s412_s3 + $0x38] sm:$0xff] }
   0x4   :  { %v259_v12 = vpack.c.bf16 %v64_v10, %v63_v9  ;;  %v262_v16 = vpack.c.bf16 %v66_v14, %v65_v13  ;;  %v67_v17 = vld [vmem:[%s412_s3 + $0x40] sm:$0xff]  ;;  %v68_v18 = vld [vmem:[%s412_s3 + $0x48] sm:$0xff]  ;;  %v69_v20 = vld [vmem:[%s412_s3 + $0x50] sm:$0xff] }
   0x5   :  { %254 = vmatpush3.bf16.msra.mxu0 %v253_v5  ;;  %v265_v19 = vpack.c.bf16 %v68_v18, %v67_v17  ;;  %v70_v21 = vld [vmem:[%s412_s3 + $0x58] sm:$0xff]  ;;  %v71_v23 = vld [vmem:[%s412_s3 + $0x60] sm:$0xff]  ;;  %v72_v24 = vld [vmem:[%s412_s3 + $0x68] sm:$0xff] }
   0x6   :  { %255 = vmatprep.subr.bf16.mxu0 %v292_v2  ;;  %282 = vset.pattern.permute.xlu0 %v293_v11  ;;  %v268_v22 = vpack.c.bf16 %v70_v21, %v69_v20  ;;  %v271_v25 = vpack.c.bf16 %v72_v24, %v71_v23  ;;  %v73_v26 = vld [vmem:[%s412_s3 + $0x70] sm:$0xff]  ;;  %v74_v27 = vld [vmem:[%s412_s3 + $0x78] sm:$0xff]  ;;  %v195_v30 = vld [vmem:[%s413_s1] ss:$0 sm:$0xff] }
   0x7   :  { %41 = vperm.xlu0 %282, %v27_v1   ;;  %v274_v28 = vpack.c.bf16 %v74_v27, %v73_v26  ;;  %v196_v31 = vld [vmem:[%s413_s1 + $0x1] ss:$0 sm:$0xff]  ;;  %v197_v35 = vld [vmem:[%s414_s2] ss:$0 sm:$0xff] }
   0x8   :  { %v198_v39 = vld [vmem:[%s415_s4] ss:$0 sm:$0xff] }
   0x9   :  { %257 = vmatpush3.bf16.msra.mxu0 %v256_v8  ;;  %v199_v43 = vld [vmem:[%s416_s5] ss:$0 sm:$0xff] }
   0xa   :  { %258 = vmatprep.subr.bf16.mxu0 %v292_v2 }
   0xd   :  { %260 = vmatpush3.bf16.msra.mxu0 %v259_v12 }
   0xe   :  { %261 = vmatprep.subr.bf16.mxu0 %v292_v2 }
  0x11   :  { %263 = vmatpush3.bf16.msra.mxu0 %v262_v16 }
  0x12   :  { %264 = vmatprep.subr.bf16.mxu0 %v292_v2 }
  0x15   :  { %266 = vmatpush3.bf16.msra.mxu0 %v265_v19 }
  0x16   :  { %267 = vmatprep.subr.bf16.mxu0 %v292_v2 }
  0x19   :  { %269 = vmatpush3.bf16.msra.mxu0 %v268_v22 }
  0x1a   :  { %270 = vmatprep.subr.bf16.mxu0 %v292_v2 }
  0x1d   :  { %272 = vmatpush3.bf16.msra.mxu0 %v271_v25 }
  0x1e   :  { %273 = vmatprep.subr.bf16.mxu0 %v292_v2 }
  0x21   :  { %275 = vmatpush3.bf16.msra.mxu0 %v274_v28 }
  0x81   :  { %v32_v29 = vpop.permute.xlu0 %31 }
  0x82   :  { %v38_v33 = vmul.f32 %v195_v30, %v32_v29 }
  0x86   :  { %v42_v32 = vpop.permute.xlu0 %41 }
  0x87   :  { %v48_v34 = vmul.f32 %v196_v31, %v42_v32 }
  0x89   :  { %v49_v36 = vadd.f32 %v48_v34, %v38_v33 }
  0x8b   :  { %v57_v37 = vadd.f32 %v197_v35, %v49_v36 }
  0x8d   :  { %v58_v38 = vmax.f32 %v57_v37, 0.0 }
  0x8f   :  { %250 = vmatmul.mubr.f32.vlgmr.msra.gmra.mrb[0].mxu0 %v58_v38 }
 0x162   :  { %v148_v40 = vpop.f32.mrb[0].mxu0 }
 0x163   :  { %v149_v41 = vadd.f32 %v198_v39, %v148_v40  ;;  %v251_v42 = vpop.f32.mrb[1].mxu0 }
 0x165   :  { %v152_v44 = vmax.f32 %v149_v41, 0.0 }
 0x167   :  { %v160_v45 = vmul.f32 %v199_v43, %v152_v44 }
 0x169   :  { %161 = vadd.xlane.f32.xlu1 %v160_v45 }
 0x1f6   :  { %v162_v47 = vpop.xlane.xlu1 %161 }
 0x1f7   :  { %v165_v48 = vadd.f32 %v164_v46, %v162_v47 }
 0x1f9   :  { %v167_v49 = vand.u32 2147483647, %v165_v48  ;;  %v178_v50 = vsub.f32 0.0, %v165_v48  ;;  %v166_v61 = vmax.f32 %v165_v48, 0.0 }
 0x1fb   :  { %v168_v51 = vsub.f32 0.0, %v167_v49  ;;  %v180_v52 = vand.u32 2147483647, %v178_v50  ;;  %v179_v1 = vmax.f32 %v178_v50, 0.0 }
 0x1fd   :  { %v169_v53 = vmul.f32 1.442695, %v168_v51  ;;  %v181_v54 = vsub.f32 0.0, %v180_v52 }
 0x1ff   :  { %283 = vpow2.f32 %v169_v53  ;;  %v182_v55 = vmul.f32 1.442695, %v181_v54 }
 0x201   :  { %285 = vpow2.f32 %v182_v55 }
 0x209   :  { %v284_v56 = vpop.eup %283 }
 0x20a   :  { %v171_v57 = vadd.f32 1.0, %v284_v56 }
 0x20b   :  { %v286_v58 = vpop.eup %285 }
 0x20c   :  { %287 = vlog2.f32 %v171_v57  ;;  %v184_v59 = vadd.f32 1.0, %v286_v58 }
 0x20e   :  { %289 = vlog2.f32 %v184_v59 }
 0x216   :  { %v288_v60 = vpop.eup %287 }
 0x217   :  { %v173_v62 = vmul.f32 0.6931472, %v288_v60 }
 0x218   :  { %v290_v63 = vpop.eup %289 }
 0x219   :  { %v174_v0 = vadd.f32 %v173_v62, %v166_v61  ;;  %v186_v2 = vmul.f32 0.6931472, %v290_v63 }
 0x21b   :  { %v175_v3 = vsub.f32 0.0, %v174_v0  ;;  %v187_v4 = vadd.f32 %v186_v2, %v179_v1 }
 0x21d   :  { %177 = vst.msk [vmem:[%s418_s7] sm:$0xff] %vm176_vm1, %v175_v3  ;;  %v188_v5 = vsub.f32 0.0, %v187_v4 }
 0x21f   :  { %190 = vst.msk [vmem:[%s418_s7] sm:$0xff] %vm189_vm2, %v188_v5 }

</bundles_post_ra>
